<compile_context>
chip_gen: v7x
topology: tpu7x:2x2x1
jax: 0.10.0
libtpu: 0.0.40
codegen_flags: <defaults>
</compile_context>

<pallas_src>
import jax
import jax.numpy as jnp
from jax import lax
from jax.experimental import pallas as pl
from jax.experimental.pallas import tpu as pltpu


def _round_up(x, m):
    return ((x + m - 1) // m) * m


def ff_text_kernel(ids_ref, tab_ref, w1_ref, b1_ref, w2_ref, b2_ref, o_ref):
    """Fused embedding-gather -> Linear -> ReLU -> Linear for one batch tile.

    ids_ref: [Bt, L]   int32  token ids
    tab_ref: [V, E]    bf16   frozen embedding table (VMEM resident)
    w1_ref : [L, E, H] bf16   first Linear weight, reshaped from [L*E, H]
    b1_ref : [1, H]    f32
    w2_ref : [H, Cp]   bf16   second Linear weight, zero-padded to lane-dense Cp
    b2_ref : [1, Cp]   f32
    o_ref  : [Bt, Cp]  f32    lane-dense output tile
    """
    Bt, L = ids_ref.shape
    V = tab_ref.shape[0]
    H = w1_ref.shape[2]

    ids = ids_ref[...]                                   # [Bt, L] int32
    tab = tab_ref[...]                                   # [V, E]  bf16
    lane_v = lax.broadcasted_iota(jnp.int32, (Bt, V), 1)

    # x_flat @ W1 == sum_l (onehot_l @ table) @ W1[l], accumulated in f32.
    acc = jnp.zeros((Bt, H), jnp.float32)
    for l in range(L):  # static unroll (L = max_word_length = 8)
        onehot = (ids[:, l:l + 1] == lane_v).astype(tab.dtype)            # [Bt, V]
        x_l = jnp.dot(onehot, tab, preferred_element_type=jnp.float32)    # [Bt, E]
        acc = acc + jnp.dot(
            x_l.astype(tab.dtype), w1_ref[l],
            preferred_element_type=jnp.float32)                           # [Bt, H]

    h = jnp.maximum(acc + b1_ref[...], 0.0)                               # ReLU
    out = jnp.dot(h.astype(w2_ref.dtype), w2_ref[...],
                  preferred_element_type=jnp.float32) + b2_ref[...]       # [Bt, Cp]
    o_ref[...] = out.astype(o_ref.dtype)


def ff_text_forward(token_ids, embed_weight, w1, b1, w2, b2):
    """token_ids: [B, L] int32; embed_weight: [V, E]; w1: [L*E, H]; w2: [H, C]."""
    B, L = token_ids.shape
    V, E = embed_weight.shape
    H = w1.shape[1]
    C = w2.shape[1]

    # Lane-dense output width (dense vst instead of vst.msk partial stores).
    C_pad = _round_up(C, 128)

    # Batch tiling: sublane-aligned, capped at 256 rows per tile (matches the
    # v6e/v7x 256-row MXU push); grid axis is marked "parallel" for v7x's 2 TCs.
    B_pad = _round_up(max(B, 8), 8)
    tile_b = min(256, B_pad)
    B_pad = _round_up(B_pad, tile_b)
    grid_b = B_pad // tile_b

    # Padding rows use token id 0 (valid index); their outputs are sliced off.
    ids = jnp.pad(token_ids.astype(jnp.int32), ((0, B_pad - B), (0, 0)))

    # bf16 MXU operands, f32 accumulation inside the kernel.
    tab_bf = embed_weight.astype(jnp.bfloat16)                    # [V, E]
    w1r_bf = w1.reshape(L, E, H).astype(jnp.bfloat16)             # [L, E, H]
    b1_2d = b1.reshape(1, H).astype(jnp.float32)                  # [1, H]
    w2p_bf = jnp.pad(w2, ((0, 0), (0, C_pad - C))).astype(jnp.bfloat16)   # [H, Cp]
    b2p_2d = jnp.pad(b2, (0, C_pad - C)).reshape(1, C_pad).astype(jnp.float32)

    out = pl.pallas_call(
        ff_text_kernel,
        out_shape=jax.ShapeDtypeStruct((B_pad, C_pad), jnp.float32),
        grid=(grid_b,),
        in_specs=[
            pl.BlockSpec((tile_b, L), lambda i: (i, 0)),        # token ids
            pl.BlockSpec((V, E), lambda i: (0, 0)),             # embedding table
            pl.BlockSpec((L, E, H), lambda i: (0, 0, 0)),       # W1 (reshaped)
            pl.BlockSpec((1, H), lambda i: (0, 0)),             # b1
            pl.BlockSpec((H, C_pad), lambda i: (0, 0)),         # W2 (padded)
            pl.BlockSpec((1, C_pad), lambda i: (0, 0)),         # b2 (padded)
        ],
        out_specs=pl.BlockSpec((tile_b, C_pad), lambda i: (i, 0)),
        compiler_params=pltpu.CompilerParams(
            dimension_semantics=("parallel",),
        ),
    )(ids, tab_bf, w1r_bf, b1_2d, w2p_bf, b2p_2d)

    return out[:B, :C]


if __name__ == "__main__":
    # Small, deterministic configuration consistent with the module's __init__.
    n_classes = 4
    vocab_len = 64
    embed_size = 16
    max_word_length = 8          # seq length the flatten assumes
    hidden_size = 32
    batch = 2

    key = jax.random.PRNGKey(0)
    k_emb, k_w1, k_b1, k_w2, k_b2, k_ids = jax.random.split(key, 6)

    # Deterministic "pretrained" embedding matrix (frozen in the torch module).
    embed_weight = jax.random.normal(k_emb, (vocab_len, embed_size), jnp.float32)

    in_features = max_word_length * embed_size
    # Linear weights stored already-transposed as [in, out] for y = x @ W + b.
    w1 = 0.05 * jax.random.normal(k_w1, (in_features, hidden_size), jnp.float32)
    b1 = 0.05 * jax.random.normal(k_b1, (hidden_size,), jnp.float32)
    w2 = 0.05 * jax.random.normal(k_w2, (hidden_size, n_classes), jnp.float32)
    b2 = 0.05 * jax.random.normal(k_b2, (n_classes,), jnp.float32)

    token_ids = jax.random.randint(
        k_ids, (batch, max_word_length), 0, vocab_len, dtype=jnp.int32
    )

    fwd = jax.jit(ff_text_forward)
    out = fwd(token_ids, embed_weight, w1, b1, w2, b2)
    out = jax.block_until_ready(out)

    # Pure-JAX f32 reference of the same forward pass. Tolerance is loosened
    # because the kernel feeds the MXU bf16 operands (f32 accumulation).
    x_ref = jnp.take(embed_weight, token_ids, axis=0).reshape(batch, -1)
    ref = jnp.maximum(x_ref @ w1 + b1, 0.0) @ w2 + b2
    assert out.shape == (batch, n_classes)
    assert jnp.allclose(out, ref, atol=3e-2, rtol=3e-2)

    print("KERNEL_OK")
</pallas_src>

<mosaic_0001>
module attributes {stable_mosaic.version = 11 : i64} {
  func.func @ff_text_kernel(%arg0: i32, %arg1: memref<8x8xi32, #tpu.memory_space<vmem>>, %arg2: memref<64x16xbf16, #tpu.memory_space<vmem>>, %arg3: memref<8x16x32xbf16, #tpu.memory_space<vmem>>, %arg4: memref<1x32xf32, #tpu.memory_space<vmem>>, %arg5: memref<32x128xbf16, #tpu.memory_space<vmem>>, %arg6: memref<1x128xf32, #tpu.memory_space<vmem>>, %arg7: memref<8x128xf32, #tpu.memory_space<vmem>>) attributes {dimension_semantics = [#tpu.dimension_semantics<parallel>], iteration_bounds = array<i64: 1>, scalar_prefetch = 0 : i64, scratch_operands = 0 : i64, tpu.core_type = #tpu.core_type<tc>, window_params = [{transform_indices = @transform_0, window_bounds = array<i64: 8, 8>}, {pipeline_mode = #tpu.pipeline_mode<synchronous>, transform_indices = @transform_1, window_bounds = array<i64: 64, 16>}, {pipeline_mode = #tpu.pipeline_mode<synchronous>, transform_indices = @transform_2, window_bounds = array<i64: 8, 16, 32>}, {pipeline_mode = #tpu.pipeline_mode<synchronous>, transform_indices = @transform_3, window_bounds = array<i64: 1, 32>}, {pipeline_mode = #tpu.pipeline_mode<synchronous>, transform_indices = @transform_4, window_bounds = array<i64: 32, 128>}, {pipeline_mode = #tpu.pipeline_mode<synchronous>, transform_indices = @transform_5, window_bounds = array<i64: 1, 128>}, {transform_indices = @transform_6, window_bounds = array<i64: 8, 128>}]} {
    %c0 = arith.constant 0 : index
    %c0_0 = arith.constant 0 : index
    %0 = vector.load %arg1[%c0, %c0_0] : memref<8x8xi32, #tpu.memory_space<vmem>>, vector<8x8xi32>
    %c0_1 = arith.constant 0 : index
    %c0_2 = arith.constant 0 : index
    %1 = vector.load %arg2[%c0_1, %c0_2] : memref<64x16xbf16, #tpu.memory_space<vmem>>, vector<64x16xbf16>
    %2 = tpu.iota {dimensions = array<i32: 1>} : vector<8x64xi32>
    %cst = arith.constant 0.000000e+00 : f32
    %3 = vector.broadcast %cst : f32 to vector<8x32xf32>
    %4 = vector.extract_strided_slice %0 {offsets = [0, 0], sizes = [8, 1], strides = [1, 1]} : vector<8x8xi32> to vector<8x1xi32>
    %5 = vector.broadcast %4 : vector<8x1xi32> to vector<8x64xi32>
    %6 = arith.cmpi eq, %5, %2 : vector<8x64xi32>
    %7 = arith.extui %6 : vector<8x64xi1> to vector<8x64xi32>
    %8 = arith.sitofp %7 : vector<8x64xi32> to vector<8x64xf32>
    %9 = arith.truncf %8 : vector<8x64xf32> to vector<8x64xbf16>
    %cst_3 = arith.constant dense<0.000000e+00> : vector<8x16xf32>
    %10 = tpu.matmul %9, %1, %cst_3 {dimension_numbers = #tpu.dot_dimension_numbers<[1], [0], [0], [1], [0, 0, 1, 1], [], []>} : vector<8x64xbf16>, vector<64x16xbf16>, vector<8x16xf32> -> vector<8x16xf32>
    %11 = arith.truncf %10 : vector<8x16xf32> to vector<8x16xbf16>
    %c0_4 = arith.constant 0 : index
    %c0_5 = arith.constant 0 : index
    %c0_6 = arith.constant 0 : index
    %12 = vector.load %arg3[%c0_4, %c0_5, %c0_6] : memref<8x16x32xbf16, #tpu.memory_space<vmem>>, vector<1x16x32xbf16>
    %13 = vector.shape_cast %12 : vector<1x16x32xbf16> to vector<16x32xbf16>
    %cst_7 = arith.constant dense<0.000000e+00> : vector<8x32xf32>
    %14 = tpu.matmul %11, %13, %cst_7 {dimension_numbers = #tpu.dot_dimension_numbers<[1], [0], [0], [1], [0, 0, 1, 1], [], []>} : vector<8x16xbf16>, vector<16x32xbf16>, vector<8x32xf32> -> vector<8x32xf32>
    %15 = arith.addf %3, %14 : vector<8x32xf32>
    %16 = vector.extract_strided_slice %0 {offsets = [0, 1], sizes = [8, 1], strides = [1, 1]} : vector<8x8xi32> to vector<8x1xi32>
    %17 = vector.broadcast %16 : vector<8x1xi32> to vector<8x64xi32>
    %18 = arith.cmpi eq, %17, %2 : vector<8x64xi32>
    %19 = arith.extui %18 : vector<8x64xi1> to vector<8x64xi32>
    %20 = arith.sitofp %19 : vector<8x64xi32> to vector<8x64xf32>
    %21 = arith.truncf %20 : vector<8x64xf32> to vector<8x64xbf16>
    %cst_8 = arith.constant dense<0.000000e+00> : vector<8x16xf32>
    %22 = tpu.matmul %21, %1, %cst_8 {dimension_numbers = #tpu.dot_dimension_numbers<[1], [0], [0], [1], [0, 0, 1, 1], [], []>} : vector<8x64xbf16>, vector<64x16xbf16>, vector<8x16xf32> -> vector<8x16xf32>
    %23 = arith.truncf %22 : vector<8x16xf32> to vector<8x16xbf16>
    %c1 = arith.constant 1 : index
    %c0_9 = arith.constant 0 : index
    %c0_10 = arith.constant 0 : index
    %24 = vector.load %arg3[%c1, %c0_9, %c0_10] : memref<8x16x32xbf16, #tpu.memory_space<vmem>>, vector<1x16x32xbf16>
    %25 = vector.shape_cast %24 : vector<1x16x32xbf16> to vector<16x32xbf16>
    %cst_11 = arith.constant dense<0.000000e+00> : vector<8x32xf32>
    %26 = tpu.matmul %23, %25, %cst_11 {dimension_numbers = #tpu.dot_dimension_numbers<[1], [0], [0], [1], [0, 0, 1, 1], [], []>} : vector<8x16xbf16>, vector<16x32xbf16>, vector<8x32xf32> -> vector<8x32xf32>
    %27 = arith.addf %15, %26 : vector<8x32xf32>
    %28 = vector.extract_strided_slice %0 {offsets = [0, 2], sizes = [8, 1], strides = [1, 1]} : vector<8x8xi32> to vector<8x1xi32>
    %29 = vector.broadcast %28 : vector<8x1xi32> to vector<8x64xi32>
    %30 = arith.cmpi eq, %29, %2 : vector<8x64xi32>
    %31 = arith.extui %30 : vector<8x64xi1> to vector<8x64xi32>
    %32 = arith.sitofp %31 : vector<8x64xi32> to vector<8x64xf32>
    %33 = arith.truncf %32 : vector<8x64xf32> to vector<8x64xbf16>
    %cst_12 = arith.constant dense<0.000000e+00> : vector<8x16xf32>
    %34 = tpu.matmul %33, %1, %cst_12 {dimension_numbers = #tpu.dot_dimension_numbers<[1], [0], [0], [1], [0, 0, 1, 1], [], []>} : vector<8x64xbf16>, vector<64x16xbf16>, vector<8x16xf32> -> vector<8x16xf32>
    %35 = arith.truncf %34 : vector<8x16xf32> to vector<8x16xbf16>
    %c2 = arith.constant 2 : index
    %c0_13 = arith.constant 0 : index
    %c0_14 = arith.constant 0 : index
    %36 = vector.load %arg3[%c2, %c0_13, %c0_14] : memref<8x16x32xbf16, #tpu.memory_space<vmem>>, vector<1x16x32xbf16>
    %37 = vector.shape_cast %36 : vector<1x16x32xbf16> to vector<16x32xbf16>
    %cst_15 = arith.constant dense<0.000000e+00> : vector<8x32xf32>
    %38 = tpu.matmul %35, %37, %cst_15 {dimension_numbers = #tpu.dot_dimension_numbers<[1], [0], [0], [1], [0, 0, 1, 1], [], []>} : vector<8x16xbf16>, vector<16x32xbf16>, vector<8x32xf32> -> vector<8x32xf32>
    %39 = arith.addf %27, %38 : vector<8x32xf32>
    %40 = vector.extract_strided_slice %0 {offsets = [0, 3], sizes = [8, 1], strides = [1, 1]} : vector<8x8xi32> to vector<8x1xi32>
    %41 = vector.broadcast %40 : vector<8x1xi32> to vector<8x64xi32>
    %42 = arith.cmpi eq, %41, %2 : vector<8x64xi32>
    %43 = arith.extui %42 : vector<8x64xi1> to vector<8x64xi32>
    %44 = arith.sitofp %43 : vector<8x64xi32> to vector<8x64xf32>
    %45 = arith.truncf %44 : vector<8x64xf32> to vector<8x64xbf16>
    %cst_16 = arith.constant dense<0.000000e+00> : vector<8x16xf32>
    %46 = tpu.matmul %45, %1, %cst_16 {dimension_numbers = #tpu.dot_dimension_numbers<[1], [0], [0], [1], [0, 0, 1, 1], [], []>} : vector<8x64xbf16>, vector<64x16xbf16>, vector<8x16xf32> -> vector<8x16xf32>
    %47 = arith.truncf %46 : vector<8x16xf32> to vector<8x16xbf16>
    %c3 = arith.constant 3 : index
    %c0_17 = arith.constant 0 : index
    %c0_18 = arith.constant 0 : index
    %48 = vector.load %arg3[%c3, %c0_17, %c0_18] : memref<8x16x32xbf16, #tpu.memory_space<vmem>>, vector<1x16x32xbf16>
    %49 = vector.shape_cast %48 : vector<1x16x32xbf16> to vector<16x32xbf16>
    %cst_19 = arith.constant dense<0.000000e+00> : vector<8x32xf32>
    %50 = tpu.matmul %47, %49, %cst_19 {dimension_numbers = #tpu.dot_dimension_numbers<[1], [0], [0], [1], [0, 0, 1, 1], [], []>} : vector<8x16xbf16>, vector<16x32xbf16>, vector<8x32xf32> -> vector<8x32xf32>
    %51 = arith.addf %39, %50 : vector<8x32xf32>
    %52 = vector.extract_strided_slice %0 {offsets = [0, 4], sizes = [8, 1], strides = [1, 1]} : vector<8x8xi32> to vector<8x1xi32>
    %53 = vector.broadcast %52 : vector<8x1xi32> to vector<8x64xi32>
    %54 = arith.cmpi eq, %53, %2 : vector<8x64xi32>
    %55 = arith.extui %54 : vector<8x64xi1> to vector<8x64xi32>
    %56 = arith.sitofp %55 : vector<8x64xi32> to vector<8x64xf32>
    %57 = arith.truncf %56 : vector<8x64xf32> to vector<8x64xbf16>
    %cst_20 = arith.constant dense<0.000000e+00> : vector<8x16xf32>
    %58 = tpu.matmul %57, %1, %cst_20 {dimension_numbers = #tpu.dot_dimension_numbers<[1], [0], [0], [1], [0, 0, 1, 1], [], []>} : vector<8x64xbf16>, vector<64x16xbf16>, vector<8x16xf32> -> vector<8x16xf32>
    %59 = arith.truncf %58 : vector<8x16xf32> to vector<8x16xbf16>
    %c4 = arith.constant 4 : index
    %c0_21 = arith.constant 0 : index
    %c0_22 = arith.constant 0 : index
    %60 = vector.load %arg3[%c4, %c0_21, %c0_22] : memref<8x16x32xbf16, #tpu.memory_space<vmem>>, vector<1x16x32xbf16>
    %61 = vector.shape_cast %60 : vector<1x16x32xbf16> to vector<16x32xbf16>
    %cst_23 = arith.constant dense<0.000000e+00> : vector<8x32xf32>
    %62 = tpu.matmul %59, %61, %cst_23 {dimension_numbers = #tpu.dot_dimension_numbers<[1], [0], [0], [1], [0, 0, 1, 1], [], []>} : vector<8x16xbf16>, vector<16x32xbf16>, vector<8x32xf32> -> vector<8x32xf32>
    %63 = arith.addf %51, %62 : vector<8x32xf32>
    %64 = vector.extract_strided_slice %0 {offsets = [0, 5], sizes = [8, 1], strides = [1, 1]} : vector<8x8xi32> to vector<8x1xi32>
    %65 = vector.broadcast %64 : vector<8x1xi32> to vector<8x64xi32>
    %66 = arith.cmpi eq, %65, %2 : vector<8x64xi32>
    %67 = arith.extui %66 : vector<8x64xi1> to vector<8x64xi32>
    %68 = arith.sitofp %67 : vector<8x64xi32> to vector<8x64xf32>
    %69 = arith.truncf %68 : vector<8x64xf32> to vector<8x64xbf16>
    %cst_24 = arith.constant dense<0.000000e+00> : vector<8x16xf32>
    %70 = tpu.matmul %69, %1, %cst_24 {dimension_numbers = #tpu.dot_dimension_numbers<[1], [0], [0], [1], [0, 0, 1, 1], [], []>} : vector<8x64xbf16>, vector<64x16xbf16>, vector<8x16xf32> -> vector<8x16xf32>
    %71 = arith.truncf %70 : vector<8x16xf32> to vector<8x16xbf16>
    %c5 = arith.constant 5 : index
    %c0_25 = arith.constant 0 : index
    %c0_26 = arith.constant 0 : index
    %72 = vector.load %arg3[%c5, %c0_25, %c0_26] : memref<8x16x32xbf16, #tpu.memory_space<vmem>>, vector<1x16x32xbf16>
    %73 = vector.shape_cast %72 : vector<1x16x32xbf16> to vector<16x32xbf16>
    %cst_27 = arith.constant dense<0.000000e+00> : vector<8x32xf32>
    %74 = tpu.matmul %71, %73, %cst_27 {dimension_numbers = #tpu.dot_dimension_numbers<[1], [0], [0], [1], [0, 0, 1, 1], [], []>} : vector<8x16xbf16>, vector<16x32xbf16>, vector<8x32xf32> -> vector<8x32xf32>
    %75 = arith.addf %63, %74 : vector<8x32xf32>
    %76 = vector.extract_strided_slice %0 {offsets = [0, 6], sizes = [8, 1], strides = [1, 1]} : vector<8x8xi32> to vector<8x1xi32>
    %77 = vector.broadcast %76 : vector<8x1xi32> to vector<8x64xi32>
    %78 = arith.cmpi eq, %77, %2 : vector<8x64xi32>
    %79 = arith.extui %78 : vector<8x64xi1> to vector<8x64xi32>
    %80 = arith.sitofp %79 : vector<8x64xi32> to vector<8x64xf32>
    %81 = arith.truncf %80 : vector<8x64xf32> to vector<8x64xbf16>
    %cst_28 = arith.constant dense<0.000000e+00> : vector<8x16xf32>
    %82 = tpu.matmul %81, %1, %cst_28 {dimension_numbers = #tpu.dot_dimension_numbers<[1], [0], [0], [1], [0, 0, 1, 1], [], []>} : vector<8x64xbf16>, vector<64x16xbf16>, vector<8x16xf32> -> vector<8x16xf32>
    %83 = arith.truncf %82 : vector<8x16xf32> to vector<8x16xbf16>
    %c6 = arith.constant 6 : index
    %c0_29 = arith.constant 0 : index
    %c0_30 = arith.constant 0 : index
    %84 = vector.load %arg3[%c6, %c0_29, %c0_30] : memref<8x16x32xbf16, #tpu.memory_space<vmem>>, vector<1x16x32xbf16>
    %85 = vector.shape_cast %84 : vector<1x16x32xbf16> to vector<16x32xbf16>
    %cst_31 = arith.constant dense<0.000000e+00> : vector<8x32xf32>
    %86 = tpu.matmul %83, %85, %cst_31 {dimension_numbers = #tpu.dot_dimension_numbers<[1], [0], [0], [1], [0, 0, 1, 1], [], []>} : vector<8x16xbf16>, vector<16x32xbf16>, vector<8x32xf32> -> vector<8x32xf32>
    %87 = arith.addf %75, %86 : vector<8x32xf32>
    %88 = vector.extract_strided_slice %0 {offsets = [0, 7], sizes = [8, 1], strides = [1, 1]} : vector<8x8xi32> to vector<8x1xi32>
    %89 = vector.broadcast %88 : vector<8x1xi32> to vector<8x64xi32>
    %90 = arith.cmpi eq, %89, %2 : vector<8x64xi32>
    %91 = arith.extui %90 : vector<8x64xi1> to vector<8x64xi32>
    %92 = arith.sitofp %91 : vector<8x64xi32> to vector<8x64xf32>
    %93 = arith.truncf %92 : vector<8x64xf32> to vector<8x64xbf16>
    %cst_32 = arith.constant dense<0.000000e+00> : vector<8x16xf32>
    %94 = tpu.matmul %93, %1, %cst_32 {dimension_numbers = #tpu.dot_dimension_numbers<[1], [0], [0], [1], [0, 0, 1, 1], [], []>} : vector<8x64xbf16>, vector<64x16xbf16>, vector<8x16xf32> -> vector<8x16xf32>
    %95 = arith.truncf %94 : vector<8x16xf32> to vector<8x16xbf16>
    %c7 = arith.constant 7 : index
    %c0_33 = arith.constant 0 : index
    %c0_34 = arith.constant 0 : index
    %96 = vector.load %arg3[%c7, %c0_33, %c0_34] : memref<8x16x32xbf16, #tpu.memory_space<vmem>>, vector<1x16x32xbf16>
    %97 = vector.shape_cast %96 : vector<1x16x32xbf16> to vector<16x32xbf16>
    %cst_35 = arith.constant dense<0.000000e+00> : vector<8x32xf32>
    %98 = tpu.matmul %95, %97, %cst_35 {dimension_numbers = #tpu.dot_dimension_numbers<[1], [0], [0], [1], [0, 0, 1, 1], [], []>} : vector<8x16xbf16>, vector<16x32xbf16>, vector<8x32xf32> -> vector<8x32xf32>
    %99 = arith.addf %87, %98 : vector<8x32xf32>
    %c0_36 = arith.constant 0 : index
    %c0_37 = arith.constant 0 : index
    %100 = vector.load %arg4[%c0_36, %c0_37] : memref<1x32xf32, #tpu.memory_space<vmem>>, vector<1x32xf32>
    %101 = vector.broadcast %100 : vector<1x32xf32> to vector<8x32xf32>
    %102 = arith.addf %99, %101 : vector<8x32xf32>
    %cst_38 = arith.constant 0.000000e+00 : f32
    %103 = vector.broadcast %cst_38 : f32 to vector<8x32xf32>
    %104 = arith.maximumf %102, %103 : vector<8x32xf32>
    %105 = arith.truncf %104 : vector<8x32xf32> to vector<8x32xbf16>
    %c0_39 = arith.constant 0 : index
    %c0_40 = arith.constant 0 : index
    %106 = vector.load %arg5[%c0_39, %c0_40] : memref<32x128xbf16, #tpu.memory_space<vmem>>, vector<32x128xbf16>
    %cst_41 = arith.constant dense<0.000000e+00> : vector<8x128xf32>
    %107 = tpu.matmul %105, %106, %cst_41 {dimension_numbers = #tpu.dot_dimension_numbers<[1], [0], [0], [1], [0, 0, 1, 1], [], []>} : vector<8x32xbf16>, vector<32x128xbf16>, vector<8x128xf32> -> vector<8x128xf32>
    %c0_42 = arith.constant 0 : index
    %c0_43 = arith.constant 0 : index
    %108 = vector.load %arg6[%c0_42, %c0_43] : memref<1x128xf32, #tpu.memory_space<vmem>>, vector<1x128xf32>
    %109 = vector.broadcast %108 : vector<1x128xf32> to vector<8x128xf32>
    %110 = arith.addf %107, %109 : vector<8x128xf32>
    %c0_44 = arith.constant 0 : index
    %c0_45 = arith.constant 0 : index
    %111 = vector.load %arg7[%c0_44, %c0_45] : memref<8x128xf32, #tpu.memory_space<vmem>>, vector<8x128xf32>
    tpu.vector_store %arg7[%c0_44, %c0_45], %110 {strides = array<i32>} : memref<8x128xf32, #tpu.memory_space<vmem>>, vector<8x128xf32>,
    return
  }
  func.func @transform_0(%arg0: i32) -> (i32, i32) {
    %c0_i32 = arith.constant 0 : i32
    %c0_i32_0 = arith.constant 0 : i32
    return %arg0, %c0_i32 : i32, i32
  }
  func.func @transform_1(%arg0: i32) -> (i32, i32) {
    %c0_i32 = arith.constant 0 : i32
    %c0_i32_0 = arith.constant 0 : i32
    %c0_i32_1 = arith.constant 0 : i32
    return %c0_i32, %c0_i32_0 : i32, i32
  }
  func.func @transform_2(%arg0: i32) -> (i32, i32, i32) {
    %c0_i32 = arith.constant 0 : i32
    %c0_i32_0 = arith.constant 0 : i32
    %c0_i32_1 = arith.constant 0 : i32
    %c0_i32_2 = arith.constant 0 : i32
    return %c0_i32, %c0_i32_0, %c0_i32_1 : i32, i32, i32
  }
  func.func @transform_3(%arg0: i32) -> (i32, i32) {
    %c0_i32 = arith.constant 0 : i32
    %c0_i32_0 = arith.constant 0 : i32
    %c0_i32_1 = arith.constant 0 : i32
    return %c0_i32, %c0_i32_0 : i32, i32
  }
  func.func @transform_4(%arg0: i32) -> (i32, i32) {
    %c0_i32 = arith.constant 0 : i32
    %c0_i32_0 = arith.constant 0 : i32
    %c0_i32_1 = arith.constant 0 : i32
    return %c0_i32, %c0_i32_0 : i32, i32
  }
  func.func @transform_5(%arg0: i32) -> (i32, i32) {
    %c0_i32 = arith.constant 0 : i32
    %c0_i32_0 = arith.constant 0 : i32
    %c0_i32_1 = arith.constant 0 : i32
    return %c0_i32, %c0_i32_0 : i32, i32
  }
  func.func @transform_6(%arg0: i32) -> (i32, i32) {
    %c0_i32 = arith.constant 0 : i32
    %c0_i32_0 = arith.constant 0 : i32
    return %arg0, %c0_i32 : i32, i32
  }
}

</mosaic_0001>

<bundles_post_ra>
// kernel: ff_text_forward.1
= control target key start
LH: loop header
LB: loop body
LE: loop exit
PB: predicated region body
PF: predicated region fallthrough
CT: control target
= control target key end

     0   :  { %v1271_v0 = vmov 1   ;;  %v1272_v2 = vmov 0.0   ;;  %v1273_v5 = vmov 0   ;;  %vm1274_vm0 = vmmov 0   ;;  %s1530_s0 = inlined_call_operand.vmem [shape: s32[8,8], index: 0, kind: input, shape index: {}]   ;;  %s1531_s1 = inlined_call_operand.vmem [shape: bf16[64,16], index: 1, kind: input, shape index: {}]   ;;  %s1532_s2 = inlined_call_operand.vmem [shape: bf16[8,16,32], index: 2, kind: input, shape index: {}]   ;;  %s1533_s4 = inlined_call_operand.vmem [shape: bf16[32,128], index: 4, kind: input, shape index: {}]   ;;  %s1534_s3 = inlined_call_operand.vmem [shape: f32[1,32], index: 3, kind: input, shape index: {}]   ;;  %s1535_s5 = inlined_call_operand.vmem [shape: f32[1,128], index: 5, kind: input, shape index: {}]   ;;  %s1536_s6 = inlined_call_operand.vmem [shape: f32[8,128], index: 6, kind: output, shape index: {}]  }
   0x1   :  { %1248 = vset.pattern.permute.xlu0 %v1271_v0  ;;  %v1319_v1 = vld [vmem:[%s1530_s0] sm:$0xff]  ;;  %1098 = vmatprep.subr.bf16.mxu1 %v1272_v2  ;;  %v1333_v4 = vld [vmem:[%s1531_s1 + $0x8] sm:$0xff]   ;;  %v1347_v6 = vld [vmem:[%s1531_s1 + $0x10] sm:$0xff]   ;;  %v1275_v8 = vmov 2   ;;  %v33_v9 = vlaneseq  ;;  %vm66_vm2 = vcmask 523264   ;;  %v1276_v19 = vmov 3  }
   0x2   :  { %114 = vperm.xlu0 %1248, %v1319_v1   ;;  %v1326_v3 = vld [vmem:[%s1531_s1] sm:$0xff]   ;;  %1086 = vmatprep.subr.bf16.mxu0 %v1272_v2  ;;  %v1356_v7 = vld [vmem:[%s1531_s1 + $0x18] sm:$0xff]   ;;  %v1261_v16 = vld [vmem:[%s1532_s2 + $0x8] sm:$0xff]   ;;  %vm173_vm4 = vcmask 130048   ;;  %v1277_v34 = vmov 4   ;;  %v1278_v53 = vmov 5  }
   0x3   :  { %1099 = vmatpush3.bf16.msra.mxu1 %v1326_v3  ;;  %1087 = vmatpush3.bf16.msra.mxu0 %v1326_v3  ;;  %v1366_v10 = vand.u32 127, %v33_v9  ;;  %v1262_v18 = vld [vmem:[%s1532_s2] sm:$0xff]   ;;  %v1263_v33 = vld [vmem:[%s1532_s2 + $0x10] sm:$0xff]   ;;  %v1264_v52 = vld [vmem:[%s1532_s2 + $0x18] sm:$0xff]   ;;  %vm923_vm11 = vcmask 261120  }
   0x4   :  { %1100 = vmatprep.subr.bf16.mxu1 %v1272_v2  ;;  %1088 = vmatprep.subr.bf16.mxu0 %v1272_v2  ;;  %v1265_v9 = vld [vmem:[%s1532_s2 + $0x20] sm:$0xff]  }
   0x5   :  { %1106 = vmatprep.mubr.msk.bf16.mxu1 %vm1274_vm0, %v1272_v2  ;;  %1094 = vmatprep.mubr.msk.bf16.mxu0 %vm1274_vm0, %v1272_v2 }
   0x6   :  { %1249 = vset.pattern.permute.xlu0 %v1273_v5  ;;  %1250 = vset.pattern.permute.xlu1 %v1275_v8 }
   0x7   :  { %36 = vperm.xlu0 %1249, %v1319_v1   ;;  %1101 = vmatpush3.bf16.msra.mxu1 %v1333_v4 }
   0x8   :  { %1089 = vmatpush3.bf16.msra.mxu0 %v1333_v4  ;;  %1102 = vmatprep.subr.bf16.mxu1 %v1272_v2 }
   0x9   :  { %1090 = vmatprep.subr.bf16.mxu0 %v1272_v2  ;;  %267 = vperm.xlu1 %1250, %v1319_v1  }
   0xb   :  { %1103 = vmatpush3.bf16.msra.mxu1 %v1347_v6  ;;  %1253 = vset.pattern.permute.xlu0 %v1278_v53 }
   0xc   :  { %1091 = vmatpush3.bf16.msra.mxu0 %v1347_v6  ;;  %1104 = vmatprep.subr.bf16.mxu1 %v1272_v2 }
   0xd   :  { %1092 = vmatprep.subr.bf16.mxu0 %v1272_v2  ;;  %1251 = vset.pattern.permute.xlu1 %v1276_v19 }
   0xe   :  { %371 = vperm.xlu1 %1251, %v1319_v1   ;;  %579 = vperm.xlu0 %1253, %v1319_v1  }
   0xf   :  { %1105 = vmatpush3.bf16.msra.mxu1 %v1356_v7 }
  0x10   :  { %1093 = vmatpush3.bf16.msra.mxu0 %v1356_v7  ;;  %1116 = vmatprep.subr.bf16.mxu1 %v1272_v2 }
  0x11   :  { %1110 = vmatprep.subr.bf16.mxu0 %v1272_v2 }
  0x12   :  { %1252 = vset.pattern.permute.xlu1 %v1277_v34 }
  0x13   :  { %475 = vperm.xlu1 %1252, %v1319_v1  }
  0x81   :  { %v115_v11 = vpop.permute.xlu0 %114 }
  0x82   :  { %vm116_vm1 = vcmp.eq.s32.totalorder %v115_v11, %v1366_v10  ;;  %v1279_v11 = vmov 6  }
  0x83   :  { %v978_v12 = vsel %vm116_vm1, 1.0, %v1272_v2  ;;  %1254 = vset.pattern.permute.xlu1 %v1279_v11 }
  0x84   :  { %v119_v13 = vpack.c.bf16 %v978_v12, %v978_v12  ;;  %683 = vperm.xlu1 %1254, %v1319_v1  }
  0x86   :  { %1107 = vmatmul.mubr.msk.bf16.vlgmr.msra.gmra.mrb[0].mxu1 %vm66_vm2, %v119_v13  ;;  %v37_v14 = vpop.permute.xlu0 %36 }
  0x87   :  { %vm38_vm3 = vcmp.eq.s32.totalorder %v37_v14, %v1366_v10  ;;  %1118 = vmatprep.mubr.msk.bf16.mxu1 %vm1274_vm0, %v1272_v2  ;;  %1117 = vmatpush3.bf16.msra.mxu1 %v1262_v18 }
  0x88   :  { %v972_v15 = vsel %vm38_vm3, 1.0, %v1272_v2  ;;  %1134 = vmatprep.subr.bf16.mxu1 %v1272_v2  ;;  %v268_v27 = vpop.permute.xlu1 %267 }
  0x89   :  { %v41_v17 = vpack.c.bf16 %v972_v15, %v972_v15  ;;  %vm269_vm5 = vcmp.eq.s32.totalorder %v268_v27, %v1366_v10 }
  0x8a   :  { %v986_v31 = vsel %vm269_vm5, 1.0, %v1272_v2 }
  0x8b   :  { %1095 = vmatmul.mubr.msk.bf16.vlgmr.msra.gmra.mrb[0].mxu0 %vm66_vm2, %v41_v17  ;;  %v272_v32 = vpack.c.bf16 %v986_v31, %v986_v31 }
  0x8c   :  { %1111 = vmatpush3.bf16.msra.mxu0 %v1261_v16  ;;  %1112 = vmatprep.mubr.msk.bf16.mxu0 %vm1274_vm0, %v1272_v2 }
  0x8d   :  { %1122 = vmatprep.subr.bf16.mxu0 %v1272_v2  ;;  %v372_v49 = vpop.permute.xlu1 %371 }
  0x8e   :  { %vm373_vm6 = vcmp.eq.s32.totalorder %v372_v49, %v1366_v10 }
  0x8f   :  { %v992_v50 = vsel %vm373_vm6, 1.0, %v1272_v2 }
  0x90   :  { %v376_v51 = vpack.c.bf16 %v992_v50, %v992_v50 }
  0x92   :  { %v476_v0 = vpop.permute.xlu1 %475 }
  0x93   :  { %vm477_vm7 = vcmp.eq.s32.totalorder %v476_v0, %v1366_v10 }
  0x94   :  { %v998_v5 = vsel %vm477_vm7, 1.0, %v1272_v2 }
  0x95   :  { %v480_v8 = vpack.c.bf16 %v998_v5, %v998_v5 }
 0x159   :  { %v157_v20 = vpop.f32.mrb[0].mxu1 }
 0x15a   :  { %v163_v21 = vpack.c.bf16 %v157_v20, %v157_v20  ;;  %v1108_v22 = vpop.f32.mrb[1].mxu1 }
 0x15b   :  { %v160_v23 = vpop.f32.mrb[2].mxu1  ;;  %v580_v22 = vpop.permute.xlu0 %579 }
 0x15c   :  { %v1109_v24 = vpop.f32.mrb[3].mxu1  ;;  %1113 = vmatmul.mubr.msk.bf16.vlgmr.msra.gmra.mrb[4].mxu0 %vm173_vm4, %v163_v21  ;;  %vm581_vm8 = vcmp.eq.s32.totalorder %v580_v22, %v1366_v10 }
 0x15d   :  { %1123 = vmatpush3.bf16.msra.mxu0 %v1326_v3  ;;  %1130 = vmatprep.mubr.msk.bf16.mxu0 %vm1274_vm0, %v1272_v2  ;;  %v1004_v23 = vsel %vm581_vm8, 1.0, %v1272_v2 }
 0x15e   :  { %v104_v25 = vpop.f32.mrb[0].mxu0  ;;  %1124 = vmatprep.subr.bf16.mxu0 %v1272_v2  ;;  %v584_v24 = vpack.c.bf16 %v1004_v23, %v1004_v23 }
 0x15f   :  { %v110_v26 = vpack.c.bf16 %v104_v25, %v104_v25  ;;  %v1096_v28 = vpop.f32.mrb[1].mxu0  ;;  %v1266_v25 = vld [vmem:[%s1532_s2 + $0x28] sm:$0xff]  }
 0x160   :  { %v107_v29 = vpop.f32.mrb[2].mxu0 }
 0x161   :  { %1125 = vmatpush3.bf16.msra.mxu0 %v1333_v4  ;;  %1119 = vmatmul.mubr.msk.bf16.vlgmr.msra.gmra.mrb[4].mxu1 %vm173_vm4, %v110_v26  ;;  %v1097_v30 = vpop.f32.mrb[3].mxu0  ;;  %v1280_v26 = vmov 7  }
 0x162   :  { %1126 = vmatprep.subr.bf16.mxu0 %v1272_v2  ;;  %1136 = vmatprep.mubr.msk.bf16.mxu1 %vm1274_vm0, %v1272_v2 }
 0x163   :  { %1135 = vmatpush3.bf16.msra.mxu1 %v1263_v33  ;;  %1255 = vset.pattern.permute.xlu1 %v1280_v26 }
 0x164   :  { %1140 = vmatprep.subr.bf16.mxu1 %v1272_v2  ;;  %1256 = vset.pattern.permute.xlu0 %v1280_v26 }
 0x165   :  { %1127 = vmatpush3.bf16.msra.mxu0 %v1347_v6  ;;  %787 = vperm.xlu1 %1255, %v1319_v1   ;;  %v684_v1 = vpop.permute.xlu1 %683 }
 0x166   :  { %1128 = vmatprep.subr.bf16.mxu0 %v1272_v2  ;;  %vm685_vm9 = vcmp.eq.s32.totalorder %v684_v1, %v1366_v10 }
 0x169   :  { %1129 = vmatpush3.bf16.msra.mxu0 %v1356_v7 }
 0x16a   :  { %1152 = vmatprep.subr.bf16.mxu0 %v1272_v2 }
 0x16c   :  { %1131 = vmatmul.mubr.msk.bf16.vlgmr.msra.gmra.mrb[8].mxu0 %vm66_vm2, %v272_v32 }
 0x16d   :  { %1154 = vmatprep.mubr.msk.bf16.mxu0 %vm1274_vm0, %v1272_v2  ;;  %1153 = vmatpush3.bf16.msra.mxu0 %v1264_v52 }
 0x16e   :  { %1158 = vmatprep.subr.bf16.mxu0 %v1272_v2 }
 0x1e4   :  { %v788_v50 = vpop.permute.xlu1 %787 }
 0x1e5   :  { %vm789_vm10 = vcmp.eq.s32.totalorder %v788_v50, %v1366_v10 }
 0x22f   :  { %v211_v35 = vpop.f32.mrb[4].mxu0 }
 0x230   :  { %v1114_v36 = vpop.f32.mrb[5].mxu0 }
 0x231   :  { %v214_v37 = vpop.f32.mrb[6].mxu0 }
 0x232   :  { %v1115_v38 = vpop.f32.mrb[7].mxu0  ;;  %v1010_v37 = vsel %vm685_vm9, 1.0, %v1272_v2 }
 0x233   :  { %v688_v38 = vpack.c.bf16 %v1010_v37, %v1010_v37 }
 0x234   :  { %v260_v39 = vpop.f32.mrb[4].mxu1 }
 0x235   :  { %v261_v40 = vadd.f32 %v260_v39, %v211_v35  ;;  %v1120_v41 = vpop.f32.mrb[5].mxu1  ;;  %v1267_v39 = vld [vmem:[%s1532_s2 + $0x30] sm:$0xff]  }
 0x236   :  { %v263_v42 = vpop.f32.mrb[6].mxu1 }
 0x237   :  { %v1121_v43 = vpop.f32.mrb[7].mxu1 }
 0x23f   :  { %v310_v44 = vpop.f32.mrb[8].mxu0 }
 0x240   :  { %v316_v45 = vpack.c.bf16 %v310_v44, %v310_v44  ;;  %v1132_v46 = vpop.f32.mrb[9].mxu0 }
 0x241   :  { %v313_v47 = vpop.f32.mrb[10].mxu0 }
 0x242   :  { %v1133_v48 = vpop.f32.mrb[11].mxu0  ;;  %1137 = vmatmul.mubr.msk.bf16.vlgmr.msra.gmra.mrb[8].mxu1 %vm173_vm4, %v316_v45 }
 0x243   :  { %1141 = vmatpush3.bf16.msra.mxu1 %v1326_v3  ;;  %1148 = vmatprep.mubr.msk.bf16.mxu1 %vm1274_vm0, %v1272_v2 }
 0x244   :  { %1142 = vmatprep.subr.bf16.mxu1 %v1272_v2 }
 0x247   :  { %1143 = vmatpush3.bf16.msra.mxu1 %v1333_v4 }
 0x248   :  { %1144 = vmatprep.subr.bf16.mxu1 %v1272_v2 }
 0x24b   :  { %1145 = vmatpush3.bf16.msra.mxu1 %v1347_v6 }
 0x24c   :  { %1146 = vmatprep.subr.bf16.mxu1 %v1272_v2 }
 0x24f   :  { %1147 = vmatpush3.bf16.msra.mxu1 %v1356_v7 }
 0x250   :  { %1170 = vmatprep.subr.bf16.mxu1 %v1272_v2 }
 0x252   :  { %1149 = vmatmul.mubr.msk.bf16.vlgmr.msra.gmra.mrb[12].mxu1 %vm66_vm2, %v376_v51  ;;  %v1016_v51 = vsel %vm789_vm10, 1.0, %v1272_v2 }
 0x253   :  { %1172 = vmatprep.mubr.msk.bf16.mxu1 %vm1274_vm0, %v1272_v2  ;;  %1171 = vmatpush3.bf16.msra.mxu1 %v1265_v9  ;;  %v792_v52 = vpack.c.bf16 %v1016_v51, %v1016_v51 }
 0x254   :  { %1176 = vmatprep.subr.bf16.mxu1 %v1272_v2 }
 0x315   :  { %v363_v54 = vpop.f32.mrb[8].mxu1 }
 0x316   :  { %v369_v55 = vadd.f32 %v363_v54, %v261_v40  ;;  %v1138_v56 = vpop.f32.mrb[9].mxu1 }
 0x317   :  { %v366_v57 = vpop.f32.mrb[10].mxu1 }
 0x318   :  { %v1139_v58 = vpop.f32.mrb[11].mxu1 }
 0x325   :  { %v414_v59 = vpop.f32.mrb[12].mxu1 }
 0x326   :  { %v420_v60 = vpack.c.bf16 %v414_v59, %v414_v59  ;;  %v1150_v61 = vpop.f32.mrb[13].mxu1 }
 0x327   :  { %v417_v62 = vpop.f32.mrb[14].mxu1 }
 0x328   :  { %v1151_v63 = vpop.f32.mrb[15].mxu1  ;;  %1155 = vmatmul.mubr.msk.bf16.vlgmr.msra.gmra.mrb[12].mxu0 %vm173_vm4, %v420_v60  ;;  %v1270_v60 = vld [vmem:[%s1533_s4 + $0x8] sm:$0xff]   ;;  %v1022_v62 = vld [vmem:[%s1534_s3] ss:$0 sm:$0xff] }
 0x329   :  { %1159 = vmatpush3.bf16.msra.mxu0 %v1326_v3  ;;  %1166 = vmatprep.mubr.msk.bf16.mxu0 %vm1274_vm0, %v1272_v2 }
 0x32a   :  { %1160 = vmatprep.subr.bf16.mxu0 %v1272_v2 }
 0x32d   :  { %1161 = vmatpush3.bf16.msra.mxu0 %v1333_v4 }
 0x32e   :  { %1162 = vmatprep.subr.bf16.mxu0 %v1272_v2 }
 0x331   :  { %1163 = vmatpush3.bf16.msra.mxu0 %v1347_v6 }
 0x332   :  { %1164 = vmatprep.subr.bf16.mxu0 %v1272_v2 }
 0x335   :  { %1165 = vmatpush3.bf16.msra.mxu0 %v1356_v7 }
 0x336   :  { %1188 = vmatprep.subr.bf16.mxu0 %v1272_v2 }
 0x338   :  { %1167 = vmatmul.mubr.msk.bf16.vlgmr.msra.gmra.mrb[16].mxu0 %vm66_vm2, %v480_v8 }
 0x339   :  { %1190 = vmatprep.mubr.msk.bf16.mxu0 %vm1274_vm0, %v1272_v2  ;;  %1189 = vmatpush3.bf16.msra.mxu0 %v1266_v25 }
 0x33a   :  { %1194 = vmatprep.subr.bf16.mxu0 %v1272_v2 }
 0x3fb   :  { %v467_v12 = vpop.f32.mrb[12].mxu0 }
 0x3fc   :  { %v473_v13 = vadd.f32 %v467_v12, %v369_v55  ;;  %v1156_v14 = vpop.f32.mrb[13].mxu0 }
 0x3fd   :  { %v470_v15 = vpop.f32.mrb[14].mxu0 }
 0x3fe   :  { %v1157_v16 = vpop.f32.mrb[15].mxu0 }
 0x40b   :  { %v518_v17 = vpop.f32.mrb[16].mxu0 }
 0x40c   :  { %v524_v18 = vpack.c.bf16 %v518_v17, %v518_v17  ;;  %v1168_v19 = vpop.f32.mrb[17].mxu0 }
 0x40d   :  { %v521_v20 = vpop.f32.mrb[18].mxu0 }
 0x40e   :  { %v1169_v21 = vpop.f32.mrb[19].mxu0  ;;  %1173 = vmatmul.mubr.msk.bf16.vlgmr.msra.gmra.mrb[16].mxu1 %vm173_vm4, %v524_v18 }
 0x40f   :  { %1177 = vmatpush3.bf16.msra.mxu1 %v1326_v3  ;;  %1184 = vmatprep.mubr.msk.bf16.mxu1 %vm1274_vm0, %v1272_v2 }
 0x410   :  { %1178 = vmatprep.subr.bf16.mxu1 %v1272_v2 }
 0x413   :  { %1179 = vmatpush3.bf16.msra.mxu1 %v1333_v4 }
 0x414   :  { %1180 = vmatprep.subr.bf16.mxu1 %v1272_v2 }
 0x417   :  { %1181 = vmatpush3.bf16.msra.mxu1 %v1347_v6 }
 0x418   :  { %1182 = vmatprep.subr.bf16.mxu1 %v1272_v2 }
 0x41b   :  { %1183 = vmatpush3.bf16.msra.mxu1 %v1356_v7 }
 0x41c   :  { %1206 = vmatprep.subr.bf16.mxu1 %v1272_v2 }
 0x41e   :  { %1185 = vmatmul.mubr.msk.bf16.vlgmr.msra.gmra.mrb[20].mxu1 %vm66_vm2, %v584_v24 }
 0x41f   :  { %1208 = vmatprep.mubr.msk.bf16.mxu1 %vm1274_vm0, %v1272_v2  ;;  %1207 = vmatpush3.bf16.msra.mxu1 %v1267_v39 }
 0x420   :  { %1212 = vmatprep.subr.bf16.mxu1 %v1272_v2 }
 0x4e1   :  { %v571_v27 = vpop.f32.mrb[16].mxu1 }
 0x4e2   :  { %v577_v28 = vadd.f32 %v571_v27, %v473_v13  ;;  %v1174_v29 = vpop.f32.mrb[17].mxu1 }
 0x4e3   :  { %v574_v30 = vpop.f32.mrb[18].mxu1 }
 0x4e4   :  { %v1175_v31 = vpop.f32.mrb[19].mxu1 }
 0x4f1   :  { %v622_v32 = vpop.f32.mrb[20].mxu1 }
 0x4f2   :  { %v628_v33 = vpack.c.bf16 %v622_v32, %v622_v32  ;;  %v1186_v34 = vpop.f32.mrb[21].mxu1 }
 0x4f3   :  { %v625_v35 = vpop.f32.mrb[22].mxu1 }
 0x4f4   :  { %v1187_v36 = vpop.f32.mrb[23].mxu1  ;;  %1191 = vmatmul.mubr.msk.bf16.vlgmr.msra.gmra.mrb[20].mxu0 %vm173_vm4, %v628_v33 }
 0x4f5   :  { %1195 = vmatpush3.bf16.msra.mxu0 %v1326_v3  ;;  %1202 = vmatprep.mubr.msk.bf16.mxu0 %vm1274_vm0, %v1272_v2 }
 0x4f6   :  { %1196 = vmatprep.subr.bf16.mxu0 %v1272_v2 }
 0x4f9   :  { %1197 = vmatpush3.bf16.msra.mxu0 %v1333_v4 }
 0x4fa   :  { %1198 = vmatprep.subr.bf16.mxu0 %v1272_v2 }
 0x4fd   :  { %1199 = vmatpush3.bf16.msra.mxu0 %v1347_v6 }
 0x4fe   :  { %1200 = vmatprep.subr.bf16.mxu0 %v1272_v2 }
 0x501   :  { %1201 = vmatpush3.bf16.msra.mxu0 %v1356_v7 }
 0x502   :  { %1224 = vmatprep.subr.bf16.mxu0 %v1272_v2 }
 0x504   :  { %1203 = vmatmul.mubr.msk.bf16.vlgmr.msra.gmra.mrb[24].mxu0 %vm66_vm2, %v688_v38 }
 0x505   :  { %1226 = vmatprep.mubr.msk.bf16.mxu0 %vm1274_vm0, %v1272_v2 }
 0x5c7   :  { %v675_v40 = vpop.f32.mrb[20].mxu0 }
 0x5c8   :  { %v681_v41 = vadd.f32 %v675_v40, %v577_v28  ;;  %v1192_v42 = vpop.f32.mrb[21].mxu0 }
 0x5c9   :  { %v678_v43 = vpop.f32.mrb[22].mxu0 }
 0x5ca   :  { %v1193_v44 = vpop.f32.mrb[23].mxu0 }
 0x5d7   :  { %v726_v45 = vpop.f32.mrb[24].mxu0 }
 0x5d8   :  { %v732_v46 = vpack.c.bf16 %v726_v45, %v726_v45  ;;  %v1204_v47 = vpop.f32.mrb[25].mxu0 }
 0x5d9   :  { %v729_v48 = vpop.f32.mrb[26].mxu0 }
 0x5da   :  { %v1205_v49 = vpop.f32.mrb[27].mxu0  ;;  %1209 = vmatmul.mubr.msk.bf16.vlgmr.msra.gmra.mrb[24].mxu1 %vm173_vm4, %v732_v46 }
 0x5db   :  { %1213 = vmatpush3.bf16.msra.mxu1 %v1326_v3  ;;  %1220 = vmatprep.mubr.msk.bf16.mxu1 %vm1274_vm0, %v1272_v2  ;;  %v1268_v3 = vld [vmem:[%s1532_s2 + $0x38] sm:$0xff]  }
 0x5dc   :  { %1214 = vmatprep.subr.bf16.mxu1 %v1272_v2  ;;  %1225 = vmatpush3.bf16.msra.mxu0 %v1268_v3 }
 0x5dd   :  { %1230 = vmatprep.subr.bf16.mxu0 %v1272_v2 }
 0x5df   :  { %1215 = vmatpush3.bf16.msra.mxu1 %v1333_v4 }
 0x5e0   :  { %1216 = vmatprep.subr.bf16.mxu1 %v1272_v2 }
 0x5e3   :  { %1217 = vmatpush3.bf16.msra.mxu1 %v1347_v6 }
 0x5e4   :  { %1218 = vmatprep.subr.bf16.mxu1 %v1272_v2 }
 0x5e7   :  { %1219 = vmatpush3.bf16.msra.mxu1 %v1356_v7  ;;  %v1269_v7 = vld [vmem:[%s1533_s4] sm:$0xff]  }
 0x5ea   :  { %1221 = vmatmul.mubr.msk.bf16.vlgmr.msra.gmra.mrb[28].mxu1 %vm66_vm2, %v792_v52 }
 0x6ad   :  { %v779_v4 = vpop.f32.mrb[24].mxu1 }
 0x6ae   :  { %v785_v10 = vadd.f32 %v779_v4, %v681_v41  ;;  %v1210_v53 = vpop.f32.mrb[25].mxu1 }
 0x6af   :  { %v782_v6 = vpop.f32.mrb[26].mxu1 }
 0x6b0   :  { %v1211_v54 = vpop.f32.mrb[27].mxu1 }
 0x6bd   :  { %v830_v55 = vpop.f32.mrb[28].mxu1 }
 0x6be   :  { %v836_v56 = vpack.c.bf16 %v830_v55, %v830_v55  ;;  %v1222_v57 = vpop.f32.mrb[29].mxu1 }
 0x6bf   :  { %v833_v58 = vpop.f32.mrb[30].mxu1 }
 0x6c0   :  { %v1223_v59 = vpop.f32.mrb[31].mxu1  ;;  %1227 = vmatmul.mubr.msk.bf16.vlgmr.msra.gmra.mrb[28].mxu0 %vm173_vm4, %v836_v56 }
 0x6c1   :  { %1234 = vmatprep.mubr.msk.bf16.mxu0 %vm1274_vm0, %v1272_v2  ;;  %1231 = vmatpush3.bf16.msra.mxu0 %v1269_v7 }
 0x6c2   :  { %1232 = vmatprep.subr.bf16.mxu0 %v1272_v2  ;;  %v1023_v2 = vld [vmem:[%s1535_s5] ss:$0 sm:$0xff] }
 0x6c5   :  { %1233 = vmatpush3.bf16.msra.mxu0 %v1270_v60 }
 0x793   :  { %v883_v61 = vpop.f32.mrb[28].mxu0 }
 0x794   :  { %v889_v63 = vadd.f32 %v883_v61, %v785_v10  ;;  %v1228_v0 = vpop.f32.mrb[29].mxu0 }
 0x795   :  { %v886_v5 = vpop.f32.mrb[30].mxu0 }
 0x796   :  { %v897_v8 = vadd.f32 %v1022_v62, %v889_v63  ;;  %v1229_v9 = vpop.f32.mrb[31].mxu0 }
 0x798   :  { %v898_v11 = vmax.f32 %v897_v8, 0.0 }
 0x79a   :  { %v899_v12 = vpack.c.bf16 %v898_v11, %v898_v11 }
 0x79c   :  { %1235 = vmatmul.mubr.msk.bf16.vlgmr.msra.gmra.mrb[32].mxu0 %vm923_vm11, %v899_v12 }
 0x86f   :  { %v961_v13 = vpop.f32.mrb[32].mxu0 }
 0x870   :  { %v962_v14 = vadd.f32 %v1023_v2, %v961_v13  ;;  %v1236_v15 = vpop.f32.mrb[33].mxu0 }
 0x871   :  { %v964_v16 = vpop.f32.mrb[34].mxu0 }
 0x872   :  { %967 = vst [vmem:[%s1536_s6] sm:$0xff] %v962_v14  ;;  %v1237_v17 = vpop.f32.mrb[35].mxu0 }

</bundles_post_ra>
